<compile_context>
chip_gen: v6e
topology: v6e:2x2x1
jax: 0.10.0
libtpu: 0.0.40
codegen_flags: <defaults>
</compile_context>

<pallas_src>
import functools
import math

import jax
import jax.numpy as jnp
from jax.experimental import pallas as pl
from jax.experimental.pallas import tpu as pltpu

PRIOR_VAR = (1.0, 6.0, 6.0)          # module default prior_var=[1, 6, 6]

_LOG_2PI = math.log(2.0 * math.pi)
_LOG_2 = math.log(2.0)
_LOG_THIRD = math.log(1.0 / 3.0)


def _gaussian_logpdf(v, var):
    # var is a Python constant -> log/div folded at trace time (no per-element EUP div).
    return (-0.5 * (_LOG_2PI + math.log(var))) - (0.5 / var) * (v * v)


def _gmm_logprob(v):
    """Equal-weight zero-mean GMM with variances (1, 6, 6).

    The two var=6 components are identical, so:
      log p = log( (1/3) * (N(0,1) + 2*N(0,6)) )
            = logsumexp(a1, a2 + log 2) + log(1/3)
    computed with a single exp via the log1p form.
    """
    a1 = _gaussian_logpdf(v, PRIOR_VAR[0])
    a2 = _gaussian_logpdf(v, PRIOR_VAR[1]) + _LOG_2
    return jnp.maximum(a1, a2) + jnp.log1p(jnp.exp(-jnp.abs(a1 - a2))) + _LOG_THIRD


def _softplus(x):
    # numerically stable log(1 + exp(x))
    return jnp.maximum(x, 0.0) + jnp.log1p(jnp.exp(-jnp.abs(x)))


def _normal_logprob_at_sample(sigma, eps):
    # log N(w | mu, sigma) evaluated at w = mu + sigma*eps  =>  z = eps exactly.
    return -0.5 * _LOG_2PI - jnp.log(sigma) - 0.5 * (eps * eps)


def linear_bbb_kernel(x_ref, wmu_ref, wrho_ref, weps_ref,
                      bmu_ref, brho_ref, beps_ref,
                      y_ref, logprior_ref, logpost_ref,
                      *, dout, tile_o):
    o = pl.program_id(0)

    # --- reparameterized weight / bias sampling (elementwise VPU/EUP) ---
    w_mu = wmu_ref[...]                       # (Din, TILE_O)
    w_eps = weps_ref[...]
    w_sigma = _softplus(wrho_ref[...])
    w = w_mu + w_sigma * w_eps

    b_mu = bmu_ref[...]                       # (1, TILE_O)
    b_eps = beps_ref[...]
    b_sigma = _softplus(brho_ref[...])
    b = b_mu + b_sigma * b_eps

    # --- linear: y = x @ w + b  (MXU; w already (Din, Dout), y lane-dense on Dout) ---
    y = jnp.dot(x_ref[...], w, preferred_element_type=jnp.float32)
    y_ref[...] = (y + b).astype(y_ref.dtype)

    # --- mask padded out_features columns so the scalar sums stay exact ---
    col = o * tile_o + jax.lax.broadcasted_iota(jnp.int32, (1, tile_o), 1)
    valid = (col < dout).astype(jnp.float32)  # (1, TILE_O); broadcasts over sublanes

    lp_w = jnp.sum(_gmm_logprob(w) * valid, keepdims=True)               # (1, 1)
    lp_b = jnp.sum(_gmm_logprob(b) * valid, keepdims=True)
    lq_w = jnp.sum(_normal_logprob_at_sample(w_sigma, w_eps) * valid, keepdims=True)
    lq_b = jnp.sum(_normal_logprob_at_sample(b_sigma, b_eps) * valid, keepdims=True)

    # --- accumulate across the Dout grid (resident output blocks, init at step 0) ---
    @pl.when(o == 0)
    def _():
        logprior_ref[...] = jnp.zeros_like(logprior_ref)
        logpost_ref[...] = jnp.zeros_like(logpost_ref)

    logprior_ref[...] += lp_w + lp_b
    logpost_ref[...] += lq_w + lq_b


def _round_up(x, m):
    return (x + m - 1) // m * m


@jax.jit
def linear_bbb_forward(x, w_mu, w_rho, b_mu, b_rho, w_eps, b_eps):
    B, Din = x.shape
    Dout = w_mu.shape[0]

    # Tile over out_features: largest 128-multiple such that the 3 double-buffered
    # weight streams stay within ~24 MiB (safe for v7x's 64 MiB / 32 MiB-scoped VMEM).
    vmem_budget = 24 * 1024 * 1024
    tile_o = min(512, max(128, (vmem_budget // (3 * 2 * 4 * max(Din, 8))) // 128 * 128))
    tile_o = min(tile_o, _round_up(Dout, 128))
    dout_pad = _round_up(Dout, tile_o)
    num_tiles = dout_pad // tile_o

    def prep_w(a):  # (Dout, Din) torch layout -> (Din, dout_pad)
        a = a.T
        if dout_pad != Dout:
            a = jnp.pad(a, ((0, 0), (0, dout_pad - Dout)))
        return a

    def prep_b(a):  # (Dout,) -> (1, dout_pad)
        a = a.reshape(1, Dout)
        if dout_pad != Dout:
            a = jnp.pad(a, ((0, 0), (0, dout_pad - Dout)))
        return a

    w_mu_t, w_rho_t, w_eps_t = prep_w(w_mu), prep_w(w_rho), prep_w(w_eps)
    b_mu2, b_rho2, b_eps2 = prep_b(b_mu), prep_b(b_rho), prep_b(b_eps)

    x_spec = pl.BlockSpec((B, Din), lambda o: (0, 0))
    w_spec = pl.BlockSpec((Din, tile_o), lambda o: (0, o))
    b_spec = pl.BlockSpec((1, tile_o), lambda o: (0, o))
    y_spec = pl.BlockSpec((B, tile_o), lambda o: (0, o))
    scal_spec = pl.BlockSpec((1, 1), lambda o: (0, 0))    # resident accumulator

    kernel = functools.partial(linear_bbb_kernel, dout=Dout, tile_o=tile_o)

    n_elems = (Din + 1) * dout_pad
    cost = pl.CostEstimate(
        flops=2 * B * Din * dout_pad + 16 * n_elems,
        transcendentals=5 * n_elems,                       # softplus + prior lse + log(sigma)
        bytes_accessed=4 * (3 * n_elems + B * Din + B * dout_pad + 2),
    )
    est_vmem = 4 * (2 * B * Din + 3 * 2 * (Din + 1) * tile_o + 2 * B * tile_o)
    vmem_limit = int(min(32 << 20, max(8 << 20, est_vmem + (4 << 20))))

    y_pad, log_prior, log_post = pl.pallas_call(
        kernel,
        grid=(num_tiles,),
        in_specs=[x_spec, w_spec, w_spec, w_spec, b_spec, b_spec, b_spec],
        out_specs=(y_spec, scal_spec, scal_spec),
        out_shape=(
            jax.ShapeDtypeStruct((B, dout_pad), x.dtype),
            jax.ShapeDtypeStruct((1, 1), jnp.float32),
            jax.ShapeDtypeStruct((1, 1), jnp.float32),
        ),
        compiler_params=pltpu.CompilerParams(
            # scalar accumulators are carried across the Dout axis -> "arbitrary"
            dimension_semantics=("arbitrary",),
            vmem_limit_bytes=vmem_limit,
        ),
        cost_estimate=cost,
    )(x, w_mu_t, w_rho_t, w_eps_t, b_mu2, b_rho2, b_eps2)

    return y_pad[:, :Dout], log_prior[0, 0], log_post[0, 0]


if __name__ == "__main__":
    key = jax.random.PRNGKey(0)
    k_x, k_wmu, k_wrho, k_bmu, k_brho, k_weps, k_beps = jax.random.split(key, 7)

    batch = 8
    input_features = 32
    output_features = 16

    # Deterministic parameter init matching the module's __init__ distributions.
    w_mu = jax.random.uniform(k_wmu, (output_features, input_features),
                              minval=-0.1, maxval=0.1, dtype=jnp.float32)
    w_rho = jax.random.uniform(k_wrho, (output_features, input_features),
                               minval=-3.0, maxval=-2.0, dtype=jnp.float32)
    b_mu = jax.random.uniform(k_bmu, (output_features,),
                              minval=-0.1, maxval=0.1, dtype=jnp.float32)
    b_rho = jax.random.uniform(k_brho, (output_features,),
                               minval=-3.0, maxval=-2.0, dtype=jnp.float32)

    # Reparameterization noise (Normal(0,1).sample in the torch forward).
    w_eps = jax.random.normal(k_weps, (output_features, input_features), dtype=jnp.float32)
    b_eps = jax.random.normal(k_beps, (output_features,), dtype=jnp.float32)

    x = jax.random.normal(k_x, (batch, input_features), dtype=jnp.float32)

    y, log_prior, log_post = linear_bbb_forward(x, w_mu, w_rho, b_mu, b_rho, w_eps, b_eps)
    jax.block_until_ready((y, log_prior, log_post))

    # ---- pure-JAX reference ----
    w_sigma = jnp.log1p(jnp.exp(w_rho))
    b_sigma = jnp.log1p(jnp.exp(b_rho))
    w = w_mu + w_sigma * w_eps
    b = b_mu + b_sigma * b_eps
    y_ref = x @ w.T + b

    def ref_gmm_logprob(v):
        comps = jnp.stack(
            [-0.5 * jnp.log(2.0 * jnp.pi * var) - 0.5 * v * v / var for var in PRIOR_VAR],
            axis=0)
        return jax.scipy.special.logsumexp(comps, axis=0) + jnp.log(1.0 / len(PRIOR_VAR))

    log_prior_ref = jnp.sum(ref_gmm_logprob(w)) + jnp.sum(ref_gmm_logprob(b))
    log_post_ref = (jnp.sum(jax.scipy.stats.norm.logpdf(w, w_mu, w_sigma))
                    + jnp.sum(jax.scipy.stats.norm.logpdf(b, b_mu, b_sigma)))

    assert y.shape == (batch, output_features)
    assert jnp.allclose(y, y_ref, atol=1e-5, rtol=1e-5)
    assert jnp.allclose(log_prior, log_prior_ref, rtol=1e-5, atol=1e-3)
    assert jnp.allclose(log_post, log_post_ref, rtol=1e-5, atol=1e-3)

    print("KERNEL_OK")
</pallas_src>

<mosaic_0001>
module attributes {stable_mosaic.version = 11 : i64} {
  func.func @linear_bbb_kernel(%arg0: i32, %arg1: memref<8x32xf32, #tpu.memory_space<vmem>>, %arg2: memref<32x128xf32, #tpu.memory_space<vmem>>, %arg3: memref<32x128xf32, #tpu.memory_space<vmem>>, %arg4: memref<32x128xf32, #tpu.memory_space<vmem>>, %arg5: memref<1x128xf32, #tpu.memory_space<vmem>>, %arg6: memref<1x128xf32, #tpu.memory_space<vmem>>, %arg7: memref<1x128xf32, #tpu.memory_space<vmem>>, %arg8: memref<8x128xf32, #tpu.memory_space<vmem>>, %arg9: memref<1x1xf32, #tpu.memory_space<vmem>>, %arg10: memref<1x1xf32, #tpu.memory_space<vmem>>) attributes {dimension_semantics = [#tpu.dimension_semantics<arbitrary>], iteration_bounds = array<i64: 1>, scalar_prefetch = 0 : i64, scratch_operands = 0 : i64, tpu.core_type = #tpu.core_type<tc>, window_params = [{pipeline_mode = #tpu.pipeline_mode<synchronous>, transform_indices = @transform_0, window_bounds = array<i64: 8, 32>}, {transform_indices = @transform_1, window_bounds = array<i64: 32, 128>}, {transform_indices = @transform_2, window_bounds = array<i64: 32, 128>}, {transform_indices = @transform_3, window_bounds = array<i64: 32, 128>}, {transform_indices = @transform_4, window_bounds = array<i64: 1, 128>}, {transform_indices = @transform_5, window_bounds = array<i64: 1, 128>}, {transform_indices = @transform_6, window_bounds = array<i64: 1, 128>}, {transform_indices = @transform_7, window_bounds = array<i64: 8, 128>}, {pipeline_mode = #tpu.pipeline_mode<synchronous>, transform_indices = @transform_8, window_bounds = array<i64: 1, 1>}, {pipeline_mode = #tpu.pipeline_mode<synchronous>, transform_indices = @transform_9, window_bounds = array<i64: 1, 1>}]} {
    %c0 = arith.constant 0 : index
    %c0_0 = arith.constant 0 : index
    %0 = vector.load %arg2[%c0, %c0_0] : memref<32x128xf32, #tpu.memory_space<vmem>>, vector<32x128xf32>
    %c0_1 = arith.constant 0 : index
    %c0_2 = arith.constant 0 : index
    %1 = vector.load %arg4[%c0_1, %c0_2] : memref<32x128xf32, #tpu.memory_space<vmem>>, vector<32x128xf32>
    %c0_3 = arith.constant 0 : index
    %c0_4 = arith.constant 0 : index
    %2 = vector.load %arg3[%c0_3, %c0_4] : memref<32x128xf32, #tpu.memory_space<vmem>>, vector<32x128xf32>
    %cst = arith.constant 0.000000e+00 : f32
    %3 = vector.broadcast %cst : f32 to vector<32x128xf32>
    %4 = arith.maximumf %2, %3 : vector<32x128xf32>
    %5 = math.absf %2 : vector<32x128xf32>
    %cst_5 = arith.constant 0.000000e+00 : f32
    %6 = vector.broadcast %cst_5 : f32 to vector<32x128xf32>
    %7 = arith.subf %6, %5 : vector<32x128xf32>
    %8 = math.exp %7 : vector<32x128xf32>
    %9 = math.log1p %8 : vector<32x128xf32>
    %10 = arith.addf %4, %9 : vector<32x128xf32>
    %11 = arith.mulf %10, %1 : vector<32x128xf32>
    %12 = arith.addf %0, %11 : vector<32x128xf32>
    %c0_6 = arith.constant 0 : index
    %c0_7 = arith.constant 0 : index
    %13 = vector.load %arg5[%c0_6, %c0_7] : memref<1x128xf32, #tpu.memory_space<vmem>>, vector<1x128xf32>
    %c0_8 = arith.constant 0 : index
    %c0_9 = arith.constant 0 : index
    %14 = vector.load %arg7[%c0_8, %c0_9] : memref<1x128xf32, #tpu.memory_space<vmem>>, vector<1x128xf32>
    %c0_10 = arith.constant 0 : index
    %c0_11 = arith.constant 0 : index
    %15 = vector.load %arg6[%c0_10, %c0_11] : memref<1x128xf32, #tpu.memory_space<vmem>>, vector<1x128xf32>
    %cst_12 = arith.constant 0.000000e+00 : f32
    %16 = vector.broadcast %cst_12 : f32 to vector<1x128xf32>
    %17 = arith.maximumf %15, %16 : vector<1x128xf32>
    %18 = math.absf %15 : vector<1x128xf32>
    %cst_13 = arith.constant 0.000000e+00 : f32
    %19 = vector.broadcast %cst_13 : f32 to vector<1x128xf32>
    %20 = arith.subf %19, %18 : vector<1x128xf32>
    %21 = math.exp %20 : vector<1x128xf32>
    %22 = math.log1p %21 : vector<1x128xf32>
    %23 = arith.addf %17, %22 : vector<1x128xf32>
    %24 = arith.mulf %23, %14 : vector<1x128xf32>
    %25 = arith.addf %13, %24 : vector<1x128xf32>
    %c0_14 = arith.constant 0 : index
    %c0_15 = arith.constant 0 : index
    %26 = vector.load %arg1[%c0_14, %c0_15] : memref<8x32xf32, #tpu.memory_space<vmem>>, vector<8x32xf32>
    %cst_16 = arith.constant dense<0.000000e+00> : vector<8x128xf32>
    %27 = tpu.matmul %26, %12, %cst_16 {dimension_numbers = #tpu.dot_dimension_numbers<[1], [0], [0], [1], [0, 0, 1, 1], [], []>} : vector<8x32xf32>, vector<32x128xf32>, vector<8x128xf32> -> vector<8x128xf32>
    %28 = vector.broadcast %25 : vector<1x128xf32> to vector<8x128xf32>
    %29 = arith.addf %27, %28 : vector<8x128xf32>
    %c0_17 = arith.constant 0 : index
    %c0_18 = arith.constant 0 : index
    %30 = vector.load %arg8[%c0_17, %c0_18] : memref<8x128xf32, #tpu.memory_space<vmem>>, vector<8x128xf32>
    tpu.vector_store %arg8[%c0_17, %c0_18], %29 {strides = array<i32>} : memref<8x128xf32, #tpu.memory_space<vmem>>, vector<8x128xf32>,
    %c128_i32 = arith.constant 128 : i32
    %31 = arith.muli %arg0, %c128_i32 : i32
    %32 = tpu.iota {dimensions = array<i32: 1>} : vector<1x128xi32>
    %33 = vector.broadcast %31 : i32 to vector<1x128xi32>
    %34 = arith.addi %33, %32 : vector<1x128xi32>
    %c16_i32 = arith.constant 16 : i32
    %35 = vector.broadcast %c16_i32 : i32 to vector<1x128xi32>
    %36 = arith.cmpi slt, %34, %35 : vector<1x128xi32>
    %37 = arith.extui %36 : vector<1x128xi1> to vector<1x128xi32>
    %38 = arith.sitofp %37 : vector<1x128xi32> to vector<1x128xf32>
    %39 = arith.mulf %12, %12 : vector<32x128xf32>
    %cst_19 = arith.constant 5.000000e-01 : f32
    %40 = vector.broadcast %cst_19 : f32 to vector<32x128xf32>
    %41 = arith.mulf %40, %39 : vector<32x128xf32>
    %cst_20 = arith.constant -0.918938517 : f32
    %42 = vector.broadcast %cst_20 : f32 to vector<32x128xf32>
    %43 = arith.subf %42, %41 : vector<32x128xf32>
    %44 = arith.mulf %12, %12 : vector<32x128xf32>
    %cst_21 = arith.constant 0.0833333358 : f32
    %45 = vector.broadcast %cst_21 : f32 to vector<32x128xf32>
    %46 = arith.mulf %45, %44 : vector<32x128xf32>
    %cst_22 = arith.constant -1.81481826 : f32
    %47 = vector.broadcast %cst_22 : f32 to vector<32x128xf32>
    %48 = arith.subf %47, %46 : vector<32x128xf32>
    %cst_23 = arith.constant 0.693147182 : f32
    %49 = vector.broadcast %cst_23 : f32 to vector<32x128xf32>
    %50 = arith.addf %48, %49 : vector<32x128xf32>
    %51 = arith.maximumf %43, %50 : vector<32x128xf32>
    %52 = arith.subf %43, %50 : vector<32x128xf32>
    %53 = math.absf %52 : vector<32x128xf32>
    %cst_24 = arith.constant 0.000000e+00 : f32
    %54 = vector.broadcast %cst_24 : f32 to vector<32x128xf32>
    %55 = arith.subf %54, %53 : vector<32x128xf32>
    %56 = math.exp %55 : vector<32x128xf32>
    %57 = math.log1p %56 : vector<32x128xf32>
    %58 = arith.addf %51, %57 : vector<32x128xf32>
    %cst_25 = arith.constant -1.09861231 : f32
    %59 = vector.broadcast %cst_25 : f32 to vector<32x128xf32>
    %60 = arith.addf %58, %59 : vector<32x128xf32>
    %61 = vector.broadcast %38 : vector<1x128xf32> to vector<32x128xf32>
    %62 = arith.mulf %60, %61 : vector<32x128xf32>
    %63 = vector.shape_cast %62 : vector<32x128xf32> to vector<1x32x128xf32>
    %cst_26 = arith.constant dense<0.000000e+00> : vector<1xf32>
    %64 = vector.multi_reduction <add>, %63, %cst_26 [1, 2] : vector<1x32x128xf32> to vector<1xf32>
    %65 = vector.shape_cast %64 : vector<1xf32> to vector<1x1x1xf32>
    %66 = vector.extract %65[0, 0, 0] : f32 from vector<1x1x1xf32>
    %67 = vector.broadcast %66 : f32 to vector<1x1xf32>
    %68 = arith.mulf %25, %25 : vector<1x128xf32>
    %cst_27 = arith.constant 5.000000e-01 : f32
    %69 = vector.broadcast %cst_27 : f32 to vector<1x128xf32>
    %70 = arith.mulf %69, %68 : vector<1x128xf32>
    %cst_28 = arith.constant -0.918938517 : f32
    %71 = vector.broadcast %cst_28 : f32 to vector<1x128xf32>
    %72 = arith.subf %71, %70 : vector<1x128xf32>
    %73 = arith.mulf %25, %25 : vector<1x128xf32>
    %cst_29 = arith.constant 0.0833333358 : f32
    %74 = vector.broadcast %cst_29 : f32 to vector<1x128xf32>
    %75 = arith.mulf %74, %73 : vector<1x128xf32>
    %cst_30 = arith.constant -1.81481826 : f32
    %76 = vector.broadcast %cst_30 : f32 to vector<1x128xf32>
    %77 = arith.subf %76, %75 : vector<1x128xf32>
    %cst_31 = arith.constant 0.693147182 : f32
    %78 = vector.broadcast %cst_31 : f32 to vector<1x128xf32>
    %79 = arith.addf %77, %78 : vector<1x128xf32>
    %80 = arith.maximumf %72, %79 : vector<1x128xf32>
    %81 = arith.subf %72, %79 : vector<1x128xf32>
    %82 = math.absf %81 : vector<1x128xf32>
    %cst_32 = arith.constant 0.000000e+00 : f32
    %83 = vector.broadcast %cst_32 : f32 to vector<1x128xf32>
    %84 = arith.subf %83, %82 : vector<1x128xf32>
    %85 = math.exp %84 : vector<1x128xf32>
    %86 = math.log1p %85 : vector<1x128xf32>
    %87 = arith.addf %80, %86 : vector<1x128xf32>
    %cst_33 = arith.constant -1.09861231 : f32
    %88 = vector.broadcast %cst_33 : f32 to vector<1x128xf32>
    %89 = arith.addf %87, %88 : vector<1x128xf32>
    %90 = arith.mulf %89, %38 : vector<1x128xf32>
    %91 = vector.shape_cast %90 : vector<1x128xf32> to vector<1x1x128xf32>
    %cst_34 = arith.constant dense<0.000000e+00> : vector<1xf32>
    %92 = vector.multi_reduction <add>, %91, %cst_34 [1, 2] : vector<1x1x128xf32> to vector<1xf32>
    %93 = vector.shape_cast %92 : vector<1xf32> to vector<1x1x1xf32>
    %94 = vector.extract %93[0, 0, 0] : f32 from vector<1x1x1xf32>
    %95 = vector.broadcast %94 : f32 to vector<1x1xf32>
    %96 = math.log %10 : vector<32x128xf32>
    %cst_35 = arith.constant -0.918938517 : f32
    %97 = vector.broadcast %cst_35 : f32 to vector<32x128xf32>
    %98 = arith.subf %97, %96 : vector<32x128xf32>
    %99 = arith.mulf %1, %1 : vector<32x128xf32>
    %cst_36 = arith.constant 5.000000e-01 : f32
    %100 = vector.broadcast %cst_36 : f32 to vector<32x128xf32>
    %101 = arith.mulf %100, %99 : vector<32x128xf32>
    %102 = arith.subf %98, %101 : vector<32x128xf32>
    %103 = vector.broadcast %38 : vector<1x128xf32> to vector<32x128xf32>
    %104 = arith.mulf %102, %103 : vector<32x128xf32>
    %105 = vector.shape_cast %104 : vector<32x128xf32> to vector<1x32x128xf32>
    %cst_37 = arith.constant dense<0.000000e+00> : vector<1xf32>
    %106 = vector.multi_reduction <add>, %105, %cst_37 [1, 2] : vector<1x32x128xf32> to vector<1xf32>
    %107 = vector.shape_cast %106 : vector<1xf32> to vector<1x1x1xf32>
    %108 = vector.extract %107[0, 0, 0] : f32 from vector<1x1x1xf32>
    %109 = vector.broadcast %108 : f32 to vector<1x1xf32>
    %110 = math.log %23 : vector<1x128xf32>
    %cst_38 = arith.constant -0.918938517 : f32
    %111 = vector.broadcast %cst_38 : f32 to vector<1x128xf32>
    %112 = arith.subf %111, %110 : vector<1x128xf32>
    %113 = arith.mulf %14, %14 : vector<1x128xf32>
    %cst_39 = arith.constant 5.000000e-01 : f32
    %114 = vector.broadcast %cst_39 : f32 to vector<1x128xf32>
    %115 = arith.mulf %114, %113 : vector<1x128xf32>
    %116 = arith.subf %112, %115 : vector<1x128xf32>
    %117 = arith.mulf %116, %38 : vector<1x128xf32>
    %118 = vector.shape_cast %117 : vector<1x128xf32> to vector<1x1x128xf32>
    %cst_40 = arith.constant dense<0.000000e+00> : vector<1xf32>
    %119 = vector.multi_reduction <add>, %118, %cst_40 [1, 2] : vector<1x1x128xf32> to vector<1xf32>
    %120 = vector.shape_cast %119 : vector<1xf32> to vector<1x1x1xf32>
    %121 = vector.extract %120[0, 0, 0] : f32 from vector<1x1x1xf32>
    %122 = vector.broadcast %121 : f32 to vector<1x1xf32>
    %c0_i32 = arith.constant 0 : i32
    %123 = arith.cmpi eq, %arg0, %c0_i32 : i32
    %124 = arith.extui %123 : i1 to i32
    %c0_i32_41 = arith.constant 0 : i32
    %125 = arith.cmpi ne, %124, %c0_i32_41 : i32
    scf.if %125 {
      %cst_50 = arith.constant 0.000000e+00 : f32
      %134 = vector.broadcast %cst_50 : f32 to vector<1x1xf32>
      %c0_51 = arith.constant 0 : index
      %c0_52 = arith.constant 0 : index
      %135 = vector.load %arg9[%c0_51, %c0_52] : memref<1x1xf32, #tpu.memory_space<vmem>>, vector<1x1xf32>
      tpu.vector_store %arg9[%c0_51, %c0_52], %134 {strides = array<i32>} : memref<1x1xf32, #tpu.memory_space<vmem>>, vector<1x1xf32>,
      %cst_53 = arith.constant 0.000000e+00 : f32
      %136 = vector.broadcast %cst_53 : f32 to vector<1x1xf32>
      %c0_54 = arith.constant 0 : index
      %c0_55 = arith.constant 0 : index
      %137 = vector.load %arg10[%c0_54, %c0_55] : memref<1x1xf32, #tpu.memory_space<vmem>>, vector<1x1xf32>
      tpu.vector_store %arg10[%c0_54, %c0_55], %136 {strides = array<i32>} : memref<1x1xf32, #tpu.memory_space<vmem>>, vector<1x1xf32>,
    } else {
    }
    %c0_42 = arith.constant 0 : index
    %c0_43 = arith.constant 0 : index
    %126 = vector.load %arg9[%c0_42, %c0_43] : memref<1x1xf32, #tpu.memory_space<vmem>>, vector<1x1xf32>
    %127 = arith.addf %67, %95 : vector<1x1xf32>
    %128 = arith.addf %126, %127 : vector<1x1xf32>
    %c0_44 = arith.constant 0 : index
    %c0_45 = arith.constant 0 : index
    %129 = vector.load %arg9[%c0_44, %c0_45] : memref<1x1xf32, #tpu.memory_space<vmem>>, vector<1x1xf32>
    tpu.vector_store %arg9[%c0_44, %c0_45], %128 {strides = array<i32>} : memref<1x1xf32, #tpu.memory_space<vmem>>, vector<1x1xf32>,
    %c0_46 = arith.constant 0 : index
    %c0_47 = arith.constant 0 : index
    %130 = vector.load %arg10[%c0_46, %c0_47] : memref<1x1xf32, #tpu.memory_space<vmem>>, vector<1x1xf32>
    %131 = arith.addf %109, %122 : vector<1x1xf32>
    %132 = arith.addf %130, %131 : vector<1x1xf32>
    %c0_48 = arith.constant 0 : index
    %c0_49 = arith.constant 0 : index
    %133 = vector.load %arg10[%c0_48, %c0_49] : memref<1x1xf32, #tpu.memory_space<vmem>>, vector<1x1xf32>
    tpu.vector_store %arg10[%c0_48, %c0_49], %132 {strides = array<i32>} : memref<1x1xf32, #tpu.memory_space<vmem>>, vector<1x1xf32>,
    return
  }
  func.func @transform_0(%arg0: i32) -> (i32, i32) {
    %c0_i32 = arith.constant 0 : i32
    %c0_i32_0 = arith.constant 0 : i32
    %c0_i32_1 = arith.constant 0 : i32
    return %c0_i32, %c0_i32_0 : i32, i32
  }
  func.func @transform_1(%arg0: i32) -> (i32, i32) {
    %c0_i32 = arith.constant 0 : i32
    %c0_i32_0 = arith.constant 0 : i32
    return %c0_i32, %arg0 : i32, i32
  }
  func.func @transform_2(%arg0: i32) -> (i32, i32) {
    %c0_i32 = arith.constant 0 : i32
    %c0_i32_0 = arith.constant 0 : i32
    return %c0_i32, %arg0 : i32, i32
  }
  func.func @transform_3(%arg0: i32) -> (i32, i32) {
    %c0_i32 = arith.constant 0 : i32
    %c0_i32_0 = arith.constant 0 : i32
    return %c0_i32, %arg0 : i32, i32
  }
  func.func @transform_4(%arg0: i32) -> (i32, i32) {
    %c0_i32 = arith.constant 0 : i32
    %c0_i32_0 = arith.constant 0 : i32
    return %c0_i32, %arg0 : i32, i32
  }
  func.func @transform_5(%arg0: i32) -> (i32, i32) {
    %c0_i32 = arith.constant 0 : i32
    %c0_i32_0 = arith.constant 0 : i32
    return %c0_i32, %arg0 : i32, i32
  }
  func.func @transform_6(%arg0: i32) -> (i32, i32) {
    %c0_i32 = arith.constant 0 : i32
    %c0_i32_0 = arith.constant 0 : i32
    return %c0_i32, %arg0 : i32, i32
  }
  func.func @transform_7(%arg0: i32) -> (i32, i32) {
    %c0_i32 = arith.constant 0 : i32
    %c0_i32_0 = arith.constant 0 : i32
    return %c0_i32, %arg0 : i32, i32
  }
  func.func @transform_8(%arg0: i32) -> (i32, i32) {
    %c0_i32 = arith.constant 0 : i32
    %c0_i32_0 = arith.constant 0 : i32
    %c0_i32_1 = arith.constant 0 : i32
    return %c0_i32, %c0_i32_0 : i32, i32
  }
  func.func @transform_9(%arg0: i32) -> (i32, i32) {
    %c0_i32 = arith.constant 0 : i32
    %c0_i32_0 = arith.constant 0 : i32
    %c0_i32_1 = arith.constant 0 : i32
    return %c0_i32, %c0_i32_0 : i32, i32
  }
}

</mosaic_0001>

<bundles_post_ra>
// kernel: linear_bbb_forward.1
= control target key start
LH: loop header
LB: loop body
LE: loop exit
PB: predicated region body
PF: predicated region fallthrough
CT: control target
= control target key end

     0   :  { %15 = vsyncpa [#allocation3], 0  ;;  %v627_v2 = vmov 0.0   ;;  %vm628_vm0 = vmmov 0   ;;  %s891_s0 = inlined_call_operand.vmem [shape: f32[8,32], index: 0, kind: input, shape index: {}]   ;;  %s892_s1 = inlined_call_operand.vmem [shape: f32[32,128], index: 1, kind: input, shape index: {}]   ;;  %s893_s2 = inlined_call_operand.vmem [shape: f32[32,128], index: 2, kind: input, shape index: {}]   ;;  %s894_s3 = inlined_call_operand.vmem [shape: f32[32,128], index: 3, kind: input, shape index: {}]   ;;  %s895_s4 = inlined_call_operand.vmem [shape: f32[1,128], index: 4, kind: input, shape index: {}]   ;;  %s896_s5 = inlined_call_operand.vmem [shape: f32[1,128], index: 5, kind: input, shape index: {}]   ;;  %s897_s6 = inlined_call_operand.vmem [shape: f32[1,128], index: 6, kind: input, shape index: {}]   ;;  %s898_s7 = inlined_call_operand.hbm [shape: f32[8,128], index: 7, kind: output, shape index: {0}]   ;;  %s899_s8 = inlined_call_operand.hbm [shape: f32[1,1], index: 8, kind: output, shape index: {1}]   ;;  %s900_s9 = inlined_call_operand.hbm [shape: f32[1,1], index: 9, kind: output, shape index: {2}]  }
   0x1   :  { %v685_v0 = vld [vmem:[%s893_s2] sm:$0xff]  ;;  %v690_v1 = vld [vmem:[%s893_s2 + $0x8] sm:$0xff]  ;;  %489 = vmatprep.subr.mxu0 %v627_v2  ;;  %497 = vmatprep.mubr.msk.f32.mxu0 %vm628_vm0, %v627_v2  ;;  %v697_v3 = vld [vmem:[%s893_s2 + $0x10] sm:$0xff] }
   0x2   :  { %v702_v4 = vld [vmem:[%s893_s2 + $0x18] sm:$0xff]  ;;  %v47_v5 = vand.u32 2147483647, %v685_v0  ;;  %v48_v6 = vand.u32 2147483647, %v690_v1 }
   0x3   :  { %v49_v7 = vand.u32 2147483647, %v697_v3  ;;  %v50_v8 = vand.u32 2147483647, %v702_v4  ;;  %v711_v17 = vld [vmem:[%s896_s5] sm:$0x1] }
   0x4   :  { %v51_v9 = vsub.f32 0.0, %v47_v5  ;;  %v52_v10 = vsub.f32 0.0, %v48_v6 }
   0x5   :  { %v53_v11 = vsub.f32 0.0, %v49_v7  ;;  %v54_v12 = vsub.f32 0.0, %v50_v8 }
   0x6   :  { %v55_v13 = vmul.f32 1.442695, %v51_v9  ;;  %v57_v14 = vmul.f32 1.442695, %v52_v10 }
   0x7   :  { %v59_v15 = vmul.f32 1.442695, %v53_v11  ;;  %v61_v16 = vmul.f32 1.442695, %v54_v12 }
   0x8   :  { %513 = vpow2.f32 %v55_v13 }
   0x9   :  { %515 = vpow2.f32 %v57_v14 }
   0xa   :  { %16 = vsyncpa [#allocation5], 0  ;;  %517 = vpow2.f32 %v59_v15  ;;  %v115_v18 = vand.u32 2147483647, %v711_v17  ;;  %v133_v41 = vlaneseq  ;;  %v43_v42 = vmax.f32 %v685_v0, 0.0  ;;  %v35_v52 = vld [vmem:[%s894_s3] sm:$0xff] }
   0xb   :  { %519 = vpow2.f32 %v61_v16  ;;  %v44_v47 = vmax.f32 %v690_v1, 0.0  ;;  %v45_v53 = vmax.f32 %v697_v3, 0.0  ;;  %v378_v60 = vmul.f32 %v35_v52, %v35_v52  ;;  %v36_v5 = vld [vmem:[%s894_s3 + $0x8] sm:$0xff]  ;;  %v37_v10 = vld [vmem:[%s894_s3 + $0x10] sm:$0xff] }
   0xc   :  { %v116_v19 = vsub.f32 0.0, %v115_v18  ;;  %v46_v6 = vmax.f32 %v702_v4, 0.0  ;;  %v31_v4 = vld [vmem:[%s892_s1] sm:$0xff]  ;;  %v114_v14 = vmax.f32 %v711_v17, 0.0  ;;  %v32_v16 = vld [vmem:[%s892_s1 + $0x8] sm:$0xff]  ;;  %v33_v17 = vld [vmem:[%s892_s1 + $0x10] sm:$0xff] }
   0xd   :  { %vm138_vm6 = vcmask 261120   ;;  %vm354_vm8 = vcmask 1040384   ;;  %vm429_vm14 = vcmask 0  }
   0xe   :  { %v117_v20 = vmul.f32 1.442695, %v116_v19  ;;  %430 = vst.msk [vmem:[#allocation4] sm:$0x1] %vm429_vm14, %v627_v2  ;;  %431 = vst.msk [vmem:[#allocation6] sm:$0x1] %vm429_vm14, %v627_v2 }
  0x10   :  { %521 = vpow2.f32 %v117_v20  ;;  %v38_v20 = vld [vmem:[%s894_s3 + $0x18] sm:$0xff] }
  0x15   :  { %v514_v21 = vpop.eup %513 }
  0x16   :  { %v516_v22 = vpop.eup %515  ;;  %v63_v23 = vadd.f32 1.0, %v514_v21  ;;  %v66_v29 = vmul.f32 -0.5, %v514_v21  ;;  %v69_v36 = vand.u32 2147483647, %v514_v21 }
  0x17   :  { %v518_v24 = vpop.eup %517  ;;  %v72_v25 = vadd.f32 1.0, %v516_v22  ;;  %v75_v31 = vmul.f32 -0.5, %v516_v22  ;;  %v78_v38 = vand.u32 2147483647, %v516_v22 }
  0x18   :  { %v520_v26 = vpop.eup %519  ;;  %523 = vlog2.f32 %v63_v23  ;;  %v81_v27 = vadd.f32 1.0, %v518_v24  ;;  %v84_v32 = vmul.f32 -0.5, %v518_v24  ;;  %v67_v34 = vadd.f32 1.0, %v66_v29 }
  0x19   :  { %525 = vlog2.f32 %v72_v25  ;;  %v90_v28 = vadd.f32 1.0, %v520_v26  ;;  %v93_v35 = vmul.f32 -0.5, %v520_v26  ;;  %v76_v37 = vadd.f32 1.0, %v75_v31  ;;  %v34_v31 = vld [vmem:[%s892_s1 + $0x18] sm:$0xff] }
  0x1a   :  { %527 = vlog2.f32 %v81_v27  ;;  %v85_v39 = vadd.f32 1.0, %v84_v32  ;;  %v87_v40 = vand.u32 2147483647, %v518_v24  ;;  %v68_v43 = vmul.f32 %v514_v21, %v67_v34 }
  0x1b   :  { %529 = vlog2.f32 %v90_v28  ;;  %v94_v44 = vadd.f32 1.0, %v93_v35  ;;  %vm716_vm1 = vcmp.lt.f32.partialorder %v69_v36, 0.0004427343  ;;  %v77_v49 = vmul.f32 %v516_v22, %v76_v37 }
  0x1c   :  { %v96_v50 = vand.u32 2147483647, %v520_v26  ;;  %vm724_vm2 = vcmp.lt.f32.partialorder %v78_v38, 0.0004427343  ;;  %v86_v56 = vmul.f32 %v518_v24, %v85_v39  ;;  %vm728_vm3 = vcmp.lt.f32.partialorder %v87_v40, 0.0004427343 }
  0x1d   :  { %v522_v30 = vpop.eup %521  ;;  %v95_v0 = vmul.f32 %v520_v26, %v94_v44  ;;  %v379_v28 = vmul.f32 %v36_v5, %v36_v5  ;;  %v380_v29 = vmul.f32 %v37_v10, %v37_v10  ;;  %v381_v37 = vmul.f32 %v38_v20, %v38_v20  ;;  %v112_v38 = vld [vmem:[%s897_s6] sm:$0x1] }
  0x1e   :  { %v119_v33 = vadd.f32 1.0, %v522_v30  ;;  %v122_v45 = vmul.f32 -0.5, %v522_v30  ;;  %v125_v61 = vand.u32 2147483647, %v522_v30  ;;  %vm740_vm4 = vcmp.lt.f32.partialorder %v96_v50, 0.0004427343 }
  0x1f   :  { %v385_v19 = vmul.f32 0.5, %v381_v37 }
  0x20   :  { %531 = vlog2.f32 %v119_v33  ;;  %v123_v1 = vadd.f32 1.0, %v122_v45  ;;  %vm756_vm5 = vcmp.lt.f32.partialorder %v125_v61, 0.0004427343  ;;  %v131_v61 = vld [vmem:[%s891_s0] sm:$0xff]  ;;  %s629_s0 = smov [#allocation2]  }
  0x21   :  { %s447_s14 = sshll.u32 %s629_s0, 4  ;;  %s448_s14 = int_to_ptr.vmem [resolvable:$true] %s447_s14 }
  0x22   :  { %v124_v23 = vmul.f32 %v522_v30, %v123_v1  ;;  %v215_v30 = vand.u32 127, %v133_v41  ;;  %s563_s15 = scalar_lea.vmem %s448_s14, 128  ;;  %p568_p1 = scmp.lt.s32.totalorder %s448_s14, %s448_s14 }
  0x23   :  { %p564_p0 = scmp.ne.s32.totalorder %s448_s14, %s563_s15  ;;  %p569_p2 = scmp.lt.s32.totalorder %s563_s15, %s563_s15 }
  0x24   :  { %vm218_vm7 = vcmp.lt.s32.totalorder %v215_v30, 16 }
  0x25   :  { %v524_v46 = vpop.eup %523  ;;  %p570_p3 = por %p569_p2, %p568_p1 }
  0x26   :  { %v526_v51 = vpop.eup %525  ;;  %v65_v54 = vmul.f32 0.6931472, %v524_v46 }
  0x27   :  { %v528_v57 = vpop.eup %527  ;;  %v74_v58 = vmul.f32 0.6931472, %v526_v51  ;;  %p571_p4 = pnand %p570_p3, %p564_p0 }
  0x28   :  { %v71_v62 = vsel %vm716_vm1, %v68_v43, %v65_v54  ;;  %v83_v63 = vmul.f32 0.6931472, %v528_v57  ;;  %v530_v3 = vpop.eup %529  ;;  %v111_v43 = vld [vmem:[%s895_s4] sm:$0x1]  ;;  %v383_v54 = vmul.f32 0.5, %v379_v28 }
  0x29   :  { %v80_v7 = vsel %vm724_vm2, %v77_v49, %v74_v58  ;;  %v99_v9 = vadd.f32 %v71_v62, %v43_v42  ;;  %v92_v12 = vmul.f32 0.6931472, %v530_v3  ;;  %v410_v62 = vmul.f32 %v112_v38, %v112_v38 }
  0x2a   :  { %v89_v11 = vsel %vm728_vm3, %v86_v56, %v83_v63  ;;  %v100_v13 = vadd.f32 %v80_v7, %v44_v47  ;;  %v382_v47 = vmul.f32 0.5, %v378_v60 }
  0x2b   :  { %v101_v15 = vadd.f32 %v89_v11, %v45_v53  ;;  %533 = vlog2.f32 %v99_v9  ;;  %v103_v18 = vmul.f32 %v99_v9, %v35_v52  ;;  %v98_v21 = vsel %vm740_vm4, %v95_v0, %v92_v12 }
  0x2c   :  { %v104_v22 = vmul.f32 %v100_v13, %v36_v5  ;;  %535 = vlog2.f32 %v100_v13  ;;  %v102_v25 = vadd.f32 %v98_v21, %v46_v6  ;;  %v384_v13 = vmul.f32 0.5, %v380_v29 }
  0x2d   :  { %v532_v24 = vpop.eup %531  ;;  %v105_v26 = vmul.f32 %v101_v15, %v37_v10  ;;  %537 = vlog2.f32 %v101_v15  ;;  %v107_v27 = vadd.f32 %v103_v18, %v31_v4 }
  0x2e   :  { %v108_v32 = vadd.f32 %v104_v22, %v32_v16  ;;  %v121_v33 = vmul.f32 0.6931472, %v532_v24  ;;  %v106_v34 = vmul.f32 %v102_v25, %v38_v20  ;;  %539 = vlog2.f32 %v102_v25 }
  0x2f   :  { %v109_v35 = vadd.f32 %v105_v26, %v33_v17  ;;  %v221_v36 = vmul.f32 %v107_v27, %v107_v27  ;;  %v812_v16 = vsel %vm218_vm7, 1.0, %v627_v2  ;;  %v411_v20 = vmul.f32 0.5, %v410_v62 }
  0x30   :  { %v127_v39 = vsel %vm756_vm5, %v124_v23, %v121_v33  ;;  %v222_v40 = vmul.f32 %v108_v32, %v108_v32  ;;  %v110_v42 = vadd.f32 %v106_v34, %v34_v31 }
  0x31   :  { %v128_v44 = vadd.f32 %v127_v39, %v114_v14  ;;  %v223_v45 = vmul.f32 %v109_v35, %v109_v35  ;;  %v780_v46 = vmul.f32 0.5, %v221_v36  ;;  %v233_v49 = vmul.f32 0.083333336, %v221_v36 }
  0x32   :  { %v782_v48 = vmul.f32 0.5, %v222_v40  ;;  %v234_v50 = vmul.f32 0.083333336, %v222_v40  ;;  %v224_v52 = vmul.f32 %v110_v42, %v110_v42  ;;  %490 = vmatpush3.msra.mxu0 %v110_v42 }
  0x33   :  { %v129_v51 = vmul.f32 %v128_v44, %v112_v38  ;;  %541 = vlog2.f32 %v128_v44  ;;  %v784_v53 = vmul.f32 0.5, %v223_v45  ;;  %v229_v55 = vsub.f32 -0.9189385, %v780_v46  ;;  %491 = vmatprep.subr.mxu0 %v627_v2 }
  0x34   :  { %v235_v56 = vmul.f32 0.083333336, %v223_v45  ;;  %v790_v58 = vmul.f32 0.5, %v224_v52  ;;  %v230_v59 = vsub.f32 -0.9189385, %v782_v48  ;;  %492 = vmatpush3.msra.mxu0 %v109_v35 }
  0x35   :  { %v788_v57 = vadd.f32 %v129_v51, %v111_v43  ;;  %v236_v60 = vmul.f32 0.083333336, %v224_v52  ;;  %v237_v63 = vsub.f32 -1.8148183, %v233_v49  ;;  %v238_v0 = vsub.f32 -1.8148183, %v234_v50  ;;  %493 = vmatprep.subr.mxu0 %v627_v2 }
  0x36   :  { %v239_v1 = vsub.f32 -1.8148183, %v235_v56  ;;  %v231_v3 = vsub.f32 -0.9189385, %v784_v53  ;;  %v232_v5 = vsub.f32 -0.9189385, %v790_v58  ;;  %494 = vmatpush3.msra.mxu0 %v108_v32 }
  0x37   :  { %v240_v6 = vsub.f32 -1.8148183, %v236_v60  ;;  %v799_v8 = vadd.f32 0.6931472, %v237_v63  ;;  %v801_v9 = vadd.f32 0.6931472, %v238_v0  ;;  %495 = vmatprep.subr.mxu0 %v627_v2  ;;  %v330_v14 = vmul.f32 %v788_v57, %v788_v57 }
  0x38   :  { %v534_v7 = vpop.eup %533  ;;  %v803_v10 = vadd.f32 0.6931472, %v239_v1  ;;  %496 = vmatpush3.msra.mxu0 %v107_v27 }
  0x39   :  { %v536_v11 = vpop.eup %535  ;;  %v367_v12 = vmul.f32 0.6931472, %v534_v7  ;;  %v806_v4 = vadd.f32 0.6931472, %v240_v6  ;;  %498 = vmatmul.mubr.msk.f32.vlgmr.msra.gmra.mxu0 %vm138_vm6, %v131_v61  ;;  %v249_v17 = vsub.f32 %v229_v55, %v799_v8  ;;  %v818_v23 = vmul.f32 0.5, %v330_v14 }
  0x3a   :  { %v538_v15 = vpop.eup %537  ;;  %v369_v18 = vmul.f32 0.6931472, %v536_v11  ;;  %v250_v26 = vsub.f32 %v230_v59, %v801_v9  ;;  %v251_v27 = vsub.f32 %v231_v3, %v803_v10  ;;  %v333_v1 = vmul.f32 0.083333336, %v330_v14 }
  0x3b   :  { %v371_v21 = vmul.f32 0.6931472, %v538_v15  ;;  %v374_v22 = vsub.f32 -0.9189385, %v367_v12  ;;  %v540_v24 = vpop.eup %539  ;;  %v252_v28 = vsub.f32 %v232_v5, %v806_v4  ;;  %v253_v33 = vand.u32 2147483647, %v249_v17 }
  0x3c   :  { %v375_v25 = vsub.f32 -0.9189385, %v369_v18  ;;  %v373_v29 = vmul.f32 0.6931472, %v540_v24  ;;  %v254_v35 = vand.u32 2147483647, %v250_v26 }
  0x3d   :  { %v376_v31 = vsub.f32 -0.9189385, %v371_v21  ;;  %v386_v32 = vsub.f32 %v374_v22, %v382_v47  ;;  %v255_v36 = vand.u32 2147483647, %v251_v27  ;;  %v256_v30 = vand.u32 2147483647, %v252_v28 }
  0x3e   :  { %v387_v34 = vsub.f32 %v375_v25, %v383_v54  ;;  %v377_v37 = vsub.f32 -0.9189385, %v373_v29  ;;  %v257_v40 = vsub.f32 0.0, %v253_v33  ;;  %v258_v44 = vsub.f32 0.0, %v254_v35 }
  0x3f   :  { %v388_v38 = vsub.f32 %v376_v31, %v384_v13  ;;  %v390_v39 = vmul.f32 %v812_v16, %v386_v32  ;;  %v259_v45 = vsub.f32 0.0, %v255_v36  ;;  %v260_v49 = vsub.f32 0.0, %v256_v30 }
  0x40   :  { %v542_v42 = vpop.eup %541  ;;  %v391_v43 = vmul.f32 %v812_v16, %v387_v34  ;;  %v389_v50 = vsub.f32 %v377_v37, %v385_v19  ;;  %v261_v52 = vmul.f32 1.442695, %v257_v40  ;;  %v263_v56 = vmul.f32 1.442695, %v258_v44 }
  0x41   :  { %v392_v51 = vmul.f32 %v812_v16, %v388_v38  ;;  %v408_v47 = vmul.f32 0.6931472, %v542_v42  ;;  %v265_v60 = vmul.f32 1.442695, %v259_v45  ;;  %v267_v61 = vmul.f32 1.442695, %v260_v49 }
  0x42   :  { %v394_v54 = vadd.f32 %v391_v43, %v390_v39  ;;  %v393_v62 = vmul.f32 %v812_v16, %v389_v50  ;;  %543 = vpow2.f32 %v261_v52  ;;  %v332_v11 = vsub.f32 -0.9189385, %v818_v23 }
  0x43   :  { %v409_v63 = vsub.f32 -0.9189385, %v408_v47  ;;  %545 = vpow2.f32 %v263_v56  ;;  %v334_v12 = vsub.f32 -1.8148183, %v333_v1  ;;  %v245_v42 = vmax.f32 %v229_v55, %v799_v8 }
  0x44   :  { %v395_v0 = vadd.f32 %v394_v54, %v392_v51  ;;  %547 = vpow2.f32 %v265_v60  ;;  %v246_v54 = vmax.f32 %v230_v59, %v801_v9  ;;  %v247_v8 = vmax.f32 %v231_v3, %v803_v10 }
  0x45   :  { %v412_v6 = vsub.f32 %v409_v63, %v411_v20  ;;  %549 = vpow2.f32 %v267_v61  ;;  %v835_v15 = vadd.f32 0.6931472, %v334_v12  ;;  %v248_v9 = vmax.f32 %v232_v5, %v806_v4 }
  0x46   :  { %v396_v7 = vadd.f32 %v395_v0, %v393_v62  ;;  %v134_v23 = vshrl.u32 %v133_v41, 7 }
  0x47   :  { %v413_v13 = vmul.f32 %v812_v16, %v412_v6  ;;  %v337_v19 = vsub.f32 %v332_v11, %v835_v15 }
  0x48   :  { %397 = vadd.xlane.f32.xlu1 %v396_v7 }
  0x49   :  { %v414_v18 = vsel %vm354_vm8, %v413_v13, 0.0  ;;  %v338_v14 = vand.u32 2147483647, %v337_v19 }
  0x4b   :  { %v339_v20 = vsub.f32 0.0, %v338_v14 }
  0x4c   :  { %415 = vadd.xlane.f32.xlu1 %v414_v18 }
  0x4d   :  { %v340_v22 = vmul.f32 1.442695, %v339_v20 }
  0x4f   :  { %v544_v21 = vpop.eup %543  ;;  %551 = vpow2.f32 %v340_v22 }
  0x50   :  { %v546_v17 = vpop.eup %545  ;;  %v269_v24 = vadd.f32 1.0, %v544_v21  ;;  %v272_v31 = vmul.f32 -0.5, %v544_v21  ;;  %v275_v36 = vand.u32 2147483647, %v544_v21 }
  0x51   :  { %v548_v25 = vpop.eup %547  ;;  %v278_v26 = vadd.f32 1.0, %v546_v17  ;;  %v281_v32 = vmul.f32 -0.5, %v546_v17  ;;  %v284_v37 = vand.u32 2147483647, %v546_v17 }
  0x52   :  { %v550_v27 = vpop.eup %549  ;;  %553 = vlog2.f32 %v269_v24  ;;  %v287_v28 = vadd.f32 1.0, %v548_v25  ;;  %v290_v33 = vmul.f32 -0.5, %v548_v25  ;;  %v273_v34 = vadd.f32 1.0, %v272_v31 }
  0x53   :  { %555 = vlog2.f32 %v278_v26  ;;  %v296_v29 = vadd.f32 1.0, %v550_v27  ;;  %v299_v35 = vmul.f32 -0.5, %v550_v27  ;;  %v282_v30 = vadd.f32 1.0, %v281_v32 }
  0x54   :  { %557 = vlog2.f32 %v287_v28  ;;  %v291_v38 = vadd.f32 1.0, %v290_v33  ;;  %v293_v39 = vand.u32 2147483647, %v548_v25  ;;  %v274_v43 = vmul.f32 %v544_v21, %v273_v34 }
  0x55   :  { %559 = vlog2.f32 %v296_v29  ;;  %v300_v44 = vadd.f32 1.0, %v299_v35  ;;  %vm844_vm9 = vcmp.lt.f32.partialorder %v275_v36, 0.0004427343  ;;  %v283_v50 = vmul.f32 %v546_v17, %v282_v30 }
  0x56   :  { %v302_v51 = vand.u32 2147483647, %v550_v27  ;;  %vm851_vm10 = vcmp.lt.f32.partialorder %v284_v37, 0.0004427343  ;;  %v292_v46 = vmul.f32 %v548_v25, %v291_v38  ;;  %vm294_vm11 = vcmp.lt.f32.partialorder %v293_v39, 0.0004427343 }
  0x57   :  { %v301_v48 = vmul.f32 %v550_v27, %v300_v44  ;;  %v336_v29 = vmax.f32 %v332_v11, %v835_v15  ;;  %v135_v15 = vsub.s32 0, %v134_v23 }
  0x58   :  { %vm303_vm12 = vcmp.lt.f32.partialorder %v302_v51, 0.0004427343 }
  0x59   :  { %v136_v30 = vrot.slane %v788_v57, %v135_v15 }
  0x5c   :  { %v552_v40 = vpop.eup %551 }
  0x5d   :  { %v342_v47 = vadd.f32 1.0, %v552_v40  ;;  %v345_v12 = vmul.f32 -0.5, %v552_v40  ;;  %v348_v17 = vand.u32 2147483647, %v552_v40 }
  0x5f   :  { %v554_v45 = vpop.eup %553  ;;  %561 = vlog2.f32 %v342_v47  ;;  %v346_v21 = vadd.f32 1.0, %v345_v12  ;;  %vm349_vm13 = vcmp.lt.f32.partialorder %v348_v17, 0.0004427343 }
  0x60   :  { %v556_v52 = vpop.eup %555  ;;  %v271_v56 = vmul.f32 0.6931472, %v554_v45 }
  0x61   :  { %v558_v55 = vpop.eup %557  ;;  %v280_v61 = vmul.f32 0.6931472, %v556_v52  ;;  %v347_v26 = vmul.f32 %v552_v40, %v346_v21 }
  0x62   :  { %v277_v62 = vsel %vm844_vm9, %v274_v43, %v271_v56  ;;  %v289_v63 = vmul.f32 0.6931472, %v558_v55  ;;  %v560_v59 = vpop.eup %559 }
  0x63   :  { %v286_v0 = vsel %vm851_vm10, %v283_v50, %v280_v61  ;;  %v305_v1 = vadd.f32 %v277_v62, %v245_v42  ;;  %v298_v3 = vmul.f32 0.6931472, %v560_v59 }
  0x64   :  { %v295_v53 = vsel %vm294_vm11, %v292_v46, %v289_v63  ;;  %v306_v10 = vadd.f32 %v286_v0, %v246_v54 }
  0x65   :  { %v307_v6 = vadd.f32 %v295_v53, %v247_v8  ;;  %v309_v7 = vadd.f32 -1.0986123, %v305_v1  ;;  %v304_v13 = vsel %vm303_vm12, %v301_v48, %v298_v3 }
  0x66   :  { %v310_v18 = vadd.f32 -1.0986123, %v306_v10  ;;  %v308_v19 = vadd.f32 %v304_v13, %v248_v9 }
  0x67   :  { %v311_v14 = vadd.f32 -1.0986123, %v307_v6  ;;  %v313_v20 = vmul.f32 %v812_v16, %v309_v7 }
  0x68   :  { %v314_v58 = vmul.f32 %v812_v16, %v310_v18  ;;  %v312_v5 = vadd.f32 -1.0986123, %v308_v19 }
  0x69   :  { %v315_v4 = vmul.f32 %v812_v16, %v311_v14 }
  0x6a   :  { %v317_v22 = vadd.f32 %v314_v58, %v313_v20  ;;  %v316_v24 = vmul.f32 %v812_v16, %v312_v5 }
  0x6c   :  { %v318_v25 = vadd.f32 %v317_v22, %v315_v4  ;;  %v562_v27 = vpop.eup %561 }
  0x6d   :  { %v344_v31 = vmul.f32 0.6931472, %v562_v27 }
  0x6e   :  { %v319_v28 = vadd.f32 %v318_v25, %v316_v24 }
  0x6f   :  { %v350_v32 = vsel %vm349_vm13, %v347_v26, %v344_v31 }
  0x70   :  { %320 = vadd.xlane.f32.xlu0 %v319_v28  ;;  %v351_v33 = vadd.f32 %v350_v32, %v336_v29 }
  0x72   :  { %v352_v34 = vadd.f32 -1.0986123, %v351_v33 }
  0x74   :  { %v353_v35 = vmul.f32 %v812_v16, %v352_v34 }
  0x76   :  { %v355_v36 = vsel %vm354_vm8, %v353_v35, 0.0 }
  0x77   :  { %356 = vadd.xlane.f32.xlu0 %v355_v36 }
  0xd1   :  { %v398_v11 = vpop.xlane.xlu1 %397 }
  0xd2   :  { %v399_v39 = vrot.slane %v398_v11, 4 }
  0xd5   :  { %v416_v37 = vpop.xlane.xlu1 %415 }
  0xd6   :  { %v417_v43 = vrot.slane %v416_v37, 4 }
  0xf9   :  { %v321_v16 = vpop.xlane.xlu0 %320  ;;  %v208_v38 = vpop.f32.mrf.mxu0 }
  0xfa   :  { %v322_v40 = vrot.slane %v321_v16, 4  ;;  %v209_v42 = vadd.f32 %v208_v38, %v136_v30 }
  0xfb   :  { %v499_v44 = vpop.f32.mrf.mxu0 }
  0xfc   :  { %v323_v45 = vadd.f32 %v322_v40, %v321_v16  ;;  %212 = vst [vmem:[#allocation2] sm:$0xff] %v209_v42 }
  0xfd   :  { %574 = shalt.err (!%p571_p4)
}
  0xfe   :  { %450 = dma.vmem_to_hbm [thread:$0]  %s448_s14, 128, %s898_s7, [#allocation3]   ;;  %v400_v2 = vadd.f32 %v399_v39, %v398_v11  ;;  %v324_v41 = vrot.slane %v323_v45, 2  ;;  %v418_v57 = vadd.f32 %v417_v43, %v416_v37  ;;  %v432_v3 = vld [vmem:[#allocation4] sm:$0x1] }
  0xff   :  { %s630_s18 = smov [#allocation4]   ;;  %v437_v12 = vld [vmem:[#allocation6] sm:$0x1]  ;;  %s631_s21 = smov [#allocation6]  }
 0x100   :  { %v325_v49 = vadd.f32 %v324_v41, %v323_v45  ;;  %v401_v50 = vrot.slane %v400_v2, 2  ;;  %v357_v51 = vpop.xlane.xlu0 %356  ;;  %v419_v52 = vrot.slane %v418_v57, 2  ;;  %s457_s19 = sshll.u32 %s630_s18, 4  ;;  %s467_s22 = sshll.u32 %s631_s21, 4  ;;  %s458_s19 = int_to_ptr.vmem [resolvable:$true] %s457_s19  ;;  %s468_s22 = int_to_ptr.vmem [resolvable:$true] %s467_s22 }
 0x101   :  { %v358_v54 = vrot.slane %v357_v51, 4  ;;  %s583_s23 = scalar_lea.vmem %s458_s19, 16  ;;  %s587_s24 = scalar_lea.vmem %s458_s19, 32 }
 0x102   :  { %v326_v47 = vrot.slane %v325_v49, 1  ;;  %v402_v46 = vadd.f32 %v401_v50, %v400_v2  ;;  %v420_v55 = vadd.f32 %v419_v52, %v418_v57  ;;  %p584_p5 = scmp.ne.s32.totalorder %s458_s19, %s583_s23  ;;  %p588_p6 = scmp.lt.s32.totalorder %s458_s19, %s458_s19 }
 0x103   :  { %v359_v60 = vadd.f32 %v358_v54, %v357_v51  ;;  %p589_p7 = scmp.lt.s32.totalorder %s587_s24, %s583_s23 }
 0x104   :  { %v327_v56 = vadd.f32 %v326_v47, %v325_v49  ;;  %v403_v62 = vrot.slane %v402_v46, 1  ;;  %v421_v48 = vrot.slane %v420_v55, 1 }
 0x105   :  { %v360_v8 = vrot.slane %v359_v60, 2  ;;  %p590_p8 = por %p589_p7, %p588_p6 }
 0x106   :  { %500 = vpush %v327_v56  ;;  %v404_v9 = vadd.f32 %v403_v62, %v402_v46  ;;  %v422_v0 = vadd.f32 %v421_v48, %v420_v55 }
 0x107   :  { %v361_v61 = vadd.f32 %v360_v8, %v359_v60  ;;  %p591_p9 = pnand %p590_p8, %p584_p5 }
 0x109   :  { %v362_v63 = vrot.slane %v361_v61, 1 }
 0x10b   :  { %v363_v59 = vadd.f32 %v362_v63, %v361_v61 }
 0x10d   :  { %502 = vpush %v363_v59 }
 0x10e   :  { %504 = vpush %v404_v9 }
 0x10f   :  { %506 = vpush %v422_v0 }
 0x137   :  { %s501_s7 = spop %500 }
 0x138   :  { %v329_v1 = vstv %s501_s7 }
 0x13e   :  { %s503_s17 = spop %502 }
 0x13f   :  { %v365_v53 = vstv %s503_s17  ;;  %s505_s5 = spop %504 }
 0x140   :  { %v433_v10 = vadd.f32 %v365_v53, %v329_v1  ;;  %v406_v6 = vstv %s505_s5  ;;  %s507_s20 = spop %506 }
 0x141   :  { %v424_v7 = vstv %s507_s20 }
 0x142   :  { %v434_v13 = vadd.f32 %v433_v10, %v432_v3  ;;  %v438_v18 = vadd.f32 %v424_v7, %v406_v6 }
 0x144   :  { %436 = vst.msk [vmem:[#allocation4] sm:$0x1] %vm429_vm14, %v434_v13  ;;  %v439_v19 = vadd.f32 %v438_v18, %v437_v12 }
 0x145   :  { %594 = shalt.err (!%p591_p9)
}
 0x146   :  { %460 = dma.vmem_to_hbm [thread:$0]  %s458_s19, 16, %s899_s8, [#allocation5]   ;;  %440 = vst.msk [vmem:[#allocation6] sm:$0x1] %vm429_vm14, %v439_v19 }
 0x147   :  { %s603_s27 = scalar_lea.vmem %s468_s22, 16  ;;  %s607_s28 = scalar_lea.vmem %s468_s22, 32 }
 0x148   :  { %p604_p10 = scmp.ne.s32.totalorder %s468_s22, %s603_s27  ;;  %p608_p11 = scmp.lt.s32.totalorder %s468_s22, %s468_s22 }
 0x149   :  { %p609_p12 = scmp.lt.s32.totalorder %s607_s28, %s603_s27 }
 0x14b   :  { %p610_p13 = por %p609_p12, %p608_p11 }
 0x14d   :  { %p611_p0 = pnand %p610_p13, %p604_p10 }
 0x14f   :  { %614 = shalt.err (!%p611_p0)
}
 0x150   :  { %470 = dma.vmem_to_hbm [thread:$0]  %s468_s22, 16, %s900_s9, [#allocation5]  }
 0x151   :  { %623 = dma.done.wait [#allocation3], 128  }
 0x152   :  { %624 = vsyncadd [#allocation3], 4294967168 }
 0x153   :  { %625 = dma.done.wait [#allocation5], 32  }
 0x154   :  { %626 = vsyncadd [#allocation5], 4294967264 }
 0x155   :  { %480 = vsyncpa [#allocation3], 1 }
 0x156   :  { %481 = vsyncpa [#allocation5], 1 }

</bundles_post_ra>
